<compile_context>
chip_gen: v7x
topology: tpu7x:2x2x1
jax: 0.10.0
libtpu: 0.0.40
codegen_flags: <defaults>
</compile_context>

<pallas_src>
import jax
import jax.numpy as jnp
from jax.experimental import pallas as pl
from jax.experimental.pallas import tpu as pltpu


_VMEM_PHYS_CAP = 64 * 1024 * 1024  # v7x per-TensorCore physical VMEM = binding budget.


def _fcnn_kernel(x_ref, w1_ref, b1_ref, w2_ref, b2_ref, out_ref):
    """Fused (x @ w1 + b1) -> ReLU -> (@ w2 + b2). MXU dtype = weight dtype, f32 accum."""
    w1 = w1_ref[...]
    w2 = w2_ref[...]
    # Cast only the streamed activation tile; weights arrive pre-cast at setup time.
    x = x_ref[...].astype(w1.dtype)
    h = jnp.dot(x, w1, preferred_element_type=jnp.float32) + b1_ref[...]
    h = jnp.maximum(h, 0.0)  # ReLU on the VPU, rides under the MXU work.
    out = (jnp.dot(h.astype(w2.dtype), w2, preferred_element_type=jnp.float32)
           + b2_ref[...])
    out_ref[...] = out.astype(out_ref.dtype)


def _round_up(n, m):
    return ((n + m - 1) // m) * m


def fcnn_forward(x, w1, b1_2d, w2, b2_2d, *, batch_tile=1024,
                 out_dtype=jnp.float32, single_buffer_weights=True):
    """Forward pass of FCNN: relu(x @ w1 + b1) @ w2 + b2.

    x: [B, D_in]; w1: [D_in, H]; b1_2d: [1, H]; w2: [H, D_out]; b2_2d: [1, D_out].
    Weights may be f32 or bf16 (bf16 => bf16 MXU operands with f32 accumulation).
    """
    B, D_in = x.shape
    H = w1.shape[1]
    D_out = w2.shape[1]

    def nbytes(arr):
        return arr.size * jnp.dtype(arr.dtype).itemsize

    # ---- Small problem: gridless call, everything VMEM-resident (no pipeline cost). --
    # This path is fixed-overhead / padded-vreg dominated (dims below one (8,128) tile,
    # D_out<128 forces masked stores) — not worth further kernel-side tuning.
    if B <= batch_tile:
        return pl.pallas_call(
            _fcnn_kernel,
            out_shape=jax.ShapeDtypeStruct((B, D_out), out_dtype),
            in_specs=[pl.BlockSpec(memory_space=pltpu.MemorySpace.VMEM)] * 5,
            out_specs=pl.BlockSpec(memory_space=pltpu.MemorySpace.VMEM),
        )(x, w1, b1_2d, w2, b2_2d)

    # ---- Whole-weight VMEM residency guard (worst case: double-buffered weights). ----
    resident_bytes = 2 * (nbytes(w1) + nbytes(w2) + nbytes(b1_2d) + nbytes(b2_2d))
    if resident_bytes > _VMEM_PHYS_CAP // 2:
        # TODO(synk): add a K-tiled variant (grid axis over D_in / H with a f32 VMEM
        # accumulator and @pl.when init/finalize) for weights too large to stay resident.
        raise NotImplementedError(
            f"weights need ~{resident_bytes / 2**20:.1f} MiB resident VMEM; "
            "K-tiling required for this size")

    # ---- Batch tiling: no padding/slicing; keep an even tile count for v7x megacore. -
    TB = batch_tile
    num_tiles = pl.cdiv(B, TB)
    if num_tiles > 1 and num_tiles % 2 == 1:
        num_tiles += 1                                  # balance across 2 TensorCores
        TB = max(8, _round_up(pl.cdiv(B, num_tiles), 8))
        num_tiles = pl.cdiv(B, TB)

    # Scoped-VMEM budget from the actual footprint (v5e's default is only 16 MiB).
    vmem_limit = min(
        _VMEM_PHYS_CAP,
        2 * TB * D_in * jnp.dtype(x.dtype).itemsize          # x: double-buffered stream
        + 2 * TB * D_out * jnp.dtype(out_dtype).itemsize     # out: double-buffered stream
        + TB * H * 4                                          # f32 hidden activations
        + resident_bytes                                      # weights/biases (worst case)
        + 8 * 1024 * 1024,                                    # compiler scratch headroom
    )

    def call(weight_pipeline_mode):
        wkw = ({} if weight_pipeline_mode is None
               else {"pipeline_mode": weight_pipeline_mode})
        return pl.pallas_call(
            _fcnn_kernel,
            out_shape=jax.ShapeDtypeStruct((B, D_out), out_dtype),
            grid=(num_tiles,),
            in_specs=[
                # x: streamed per tile. (If a profile shows exposed input DMA, sweep
                # pipeline_mode=pl.Buffered(3) here — don't add it blindly.)
                pl.BlockSpec((TB, D_in), lambda i: (i, 0)),
                pl.BlockSpec((D_in, H), lambda i: (0, 0), **wkw),   # w1: VMEM-resident
                pl.BlockSpec((1, H), lambda i: (0, 0), **wkw),      # b1: VMEM-resident
                pl.BlockSpec((H, D_out), lambda i: (0, 0), **wkw),  # w2: VMEM-resident
                pl.BlockSpec((1, D_out), lambda i: (0, 0), **wkw),  # b2: VMEM-resident
            ],
            # out_shape is the true (B, D_out): the partial last block's writes are
            # clipped by Pallas — no pad / slice HBM passes.
            out_specs=pl.BlockSpec((TB, D_out), lambda i: (i, 0)),
            compiler_params=pltpu.CompilerParams(
                dimension_semantics=("parallel",),  # megacore-shard the batch axis
                vmem_limit_bytes=int(vmem_limit),
            ),
        )(x, w1, b1_2d, w2, b2_2d)

    if single_buffer_weights:
        try:
            # Constant index_map, never revisited with new data: one buffer suffices and
            # halves resident weight VMEM (biggest win under v7x's 64 MiB VMEM).
            return call(pl.Buffered(1))
        except Exception:  # pragma: no cover — fall back if Buffered(1) is unsupported.
            pass
    return call(None)


def reference_forward(x, w1, b1_2d, w2, b2_2d):
    w1f = w1.astype(jnp.float32)
    w2f = w2.astype(jnp.float32)
    h = jnp.maximum(x @ w1f + b1_2d, 0.0)
    return h @ w2f + b2_2d


def _make_params(key, d_in, d_h, d_out, weight_dtype=jnp.float32):
    """torch.nn.Linear-style uniform init; weights stored pre-transposed [in, out] and
    pre-cast ONCE to weight_dtype; biases reshaped ONCE to [1, n] and kept f32."""
    kw1, kb1, kw2, kb2 = jax.random.split(key, 4)
    bound1 = 1.0 / (d_in ** 0.5)
    bound2 = 1.0 / (d_h ** 0.5)
    w1 = jax.random.uniform(kw1, (d_in, d_h), jnp.float32, -bound1, bound1)
    b1 = jax.random.uniform(kb1, (d_h,), jnp.float32, -bound1, bound1).reshape(1, -1)
    w2 = jax.random.uniform(kw2, (d_h, d_out), jnp.float32, -bound2, bound2)
    b2 = jax.random.uniform(kb2, (d_out,), jnp.float32, -bound2, bound2).reshape(1, -1)
    return w1.astype(weight_dtype), b1, w2.astype(weight_dtype), b2


if __name__ == "__main__":
    key = jax.random.PRNGKey(0)
    k_small, k_big, kp_small, kp_big = jax.random.split(key, 4)

    # ---- Case 1: tiny shapes implied by the module (gridless fast path). -------------
    batch, d_in, d_h, d_out = 8, 16, 32, 8
    x_s = jax.random.normal(k_small, (batch, d_in), dtype=jnp.float32)
    w1_s, b1_s, w2_s, b2_s = _make_params(kp_small, d_in, d_h, d_out)
    out_s = jax.block_until_ready(fcnn_forward(x_s, w1_s, b1_s, w2_s, b2_s))
    ref_s = reference_forward(x_s, w1_s, b1_s, w2_s, b2_s)
    assert out_s.shape == (batch, d_out)
    assert jnp.allclose(out_s, ref_s, atol=1e-5, rtol=1e-5)

    # ---- Case 2: tiled path, f32 weights. B chosen so the naive tile count is odd ----
    # (exercises the even-tile rebalance for v7x) and the last block is partial
    # (exercises clipped writeback with no pad / slice).
    B2, D2 = 2500, 128
    x_b = jax.random.normal(k_big, (B2, D2), dtype=jnp.float32)
    w1_b, b1_b, w2_b, b2_b = _make_params(kp_big, D2, D2, D2)
    out_b = jax.block_until_ready(fcnn_forward(x_b, w1_b, b1_b, w2_b, b2_b))
    ref_b = reference_forward(x_b, w1_b, b1_b, w2_b, b2_b)
    assert out_b.shape == (B2, D2)
    assert jnp.allclose(out_b, ref_b, atol=5e-3, rtol=5e-3)

    # ---- Case 3: tiled path, bf16-stored weights + bf16 output stream. ---------------
    w1_h, b1_h, w2_h, b2_h = _make_params(kp_big, D2, D2, D2, weight_dtype=jnp.bfloat16)
    out_h = jax.block_until_ready(
        fcnn_forward(x_b, w1_h, b1_h, w2_h, b2_h, out_dtype=jnp.bfloat16))
    ref_h = reference_forward(x_b, w1_h, b1_h, w2_h, b2_h)
    assert out_h.dtype == jnp.bfloat16
    assert jnp.allclose(out_h.astype(jnp.float32), ref_h, atol=3e-2, rtol=3e-2)

    print("KERNEL_OK")
</pallas_src>

<mosaic_0001>
module attributes {stable_mosaic.version = 11 : i64} {
  func.func @_fcnn_kernel(%arg0: memref<8x16xf32, #tpu.memory_space<vmem>>, %arg1: memref<16x32xf32, #tpu.memory_space<vmem>>, %arg2: memref<1x32xf32, #tpu.memory_space<vmem>>, %arg3: memref<32x8xf32, #tpu.memory_space<vmem>>, %arg4: memref<1x8xf32, #tpu.memory_space<vmem>>, %arg5: memref<8x8xf32, #tpu.memory_space<vmem>>) attributes {dimension_semantics = [], scalar_prefetch = 0 : i64, scratch_operands = 0 : i64, tpu.core_type = #tpu.core_type<tc>} {
    %c0 = arith.constant 0 : index
    %c0_0 = arith.constant 0 : index
    %0 = vector.load %arg1[%c0, %c0_0] : memref<16x32xf32, #tpu.memory_space<vmem>>, vector<16x32xf32>
    %c0_1 = arith.constant 0 : index
    %c0_2 = arith.constant 0 : index
    %1 = vector.load %arg3[%c0_1, %c0_2] : memref<32x8xf32, #tpu.memory_space<vmem>>, vector<32x8xf32>
    %c0_3 = arith.constant 0 : index
    %c0_4 = arith.constant 0 : index
    %2 = vector.load %arg0[%c0_3, %c0_4] : memref<8x16xf32, #tpu.memory_space<vmem>>, vector<8x16xf32>
    %cst = arith.constant dense<0.000000e+00> : vector<8x32xf32>
    %3 = tpu.matmul %2, %0, %cst {dimension_numbers = #tpu.dot_dimension_numbers<[1], [0], [0], [1], [0, 0, 1, 1], [], []>} : vector<8x16xf32>, vector<16x32xf32>, vector<8x32xf32> -> vector<8x32xf32>
    %c0_5 = arith.constant 0 : index
    %c0_6 = arith.constant 0 : index
    %4 = vector.load %arg2[%c0_5, %c0_6] : memref<1x32xf32, #tpu.memory_space<vmem>>, vector<1x32xf32>
    %5 = vector.broadcast %4 : vector<1x32xf32> to vector<8x32xf32>
    %6 = arith.addf %3, %5 : vector<8x32xf32>
    %cst_7 = arith.constant 0.000000e+00 : f32
    %7 = vector.broadcast %cst_7 : f32 to vector<8x32xf32>
    %8 = arith.maximumf %6, %7 : vector<8x32xf32>
    %cst_8 = arith.constant dense<0.000000e+00> : vector<8x8xf32>
    %9 = tpu.matmul %8, %1, %cst_8 {dimension_numbers = #tpu.dot_dimension_numbers<[1], [0], [0], [1], [0, 0, 1, 1], [], []>} : vector<8x32xf32>, vector<32x8xf32>, vector<8x8xf32> -> vector<8x8xf32>
    %c0_9 = arith.constant 0 : index
    %c0_10 = arith.constant 0 : index
    %10 = vector.load %arg4[%c0_9, %c0_10] : memref<1x8xf32, #tpu.memory_space<vmem>>, vector<1x8xf32>
    %11 = vector.broadcast %10 : vector<1x8xf32> to vector<8x8xf32>
    %12 = arith.addf %9, %11 : vector<8x8xf32>
    %c0_11 = arith.constant 0 : index
    %c0_12 = arith.constant 0 : index
    %13 = vector.load %arg5[%c0_11, %c0_12] : memref<8x8xf32, #tpu.memory_space<vmem>>, vector<8x8xf32>
    tpu.vector_store %arg5[%c0_11, %c0_12], %12 {strides = array<i32>} : memref<8x8xf32, #tpu.memory_space<vmem>>, vector<8x8xf32>,
    return
  }
}

</mosaic_0001>

<bundles_post_ra>
// kernel: tpu_custom_call.1
= control target key start
LH: loop header
LB: loop body
LE: loop exit
PB: predicated region body
PF: predicated region fallthrough
CT: control target
= control target key end

     0   :  { %v274_v2 = vmov 0.0|0.0   ;;  %vm275_vm0 = vmmov 0   ;;  %v276_v4 = vmov 0.0   ;;  %s347_s0 = inlined_call_operand.vmem [shape: f32[8,16], index: 0, kind: input, shape index: {}]   ;;  %s348_s1 = inlined_call_operand.vmem [shape: f32[16,32], index: 1, kind: input, shape index: {}]   ;;  %s349_s2 = inlined_call_operand.vmem [shape: f32[1,32], index: 2, kind: input, shape index: {}]   ;;  %s350_s3 = inlined_call_operand.vmem [shape: f32[32,8], index: 3, kind: input, shape index: {}]   ;;  %s351_s4 = inlined_call_operand.vmem [shape: f32[1,8], index: 4, kind: input, shape index: {}]   ;;  %s352_s5 = inlined_call_operand.hbm [shape: f32[8,8], index: 5, kind: output, shape index: {}]  }
   0x1   :  { %v21_v0 = vld [vmem:[%s348_s1] sm:$0xff]  ;;  %v22_v1 = vld [vmem:[%s348_s1 + $0x8] sm:$0xff]  ;;  %237 = vmatprep.subr.bf16.mxu0 %v274_v2  ;;  %223 = vmatprep.mubr.msk.f32.mxu0 %vm275_vm0, %v276_v4 }
   0x2   :  { %v238_v3 = vpack.c.bf16 %v22_v1, %v21_v0  ;;  %v23_v5 = vld [vmem:[%s350_s3] sm:$0xff]  ;;  %v24_v6 = vld [vmem:[%s350_s3 + $0x8] sm:$0xff]  ;;  %240 = vmatprep.subr.bf16.mxu1 %v274_v2  ;;  %234 = vmatprep.mubr.msk.f32.mxu1 %vm275_vm0, %v276_v4 }
   0x3   :  { %v241_v7 = vpack.c.bf16 %v24_v6, %v23_v5 }
   0x4   :  { %10 = vsyncpa [#allocation3], 0  ;;  %239 = vmatpush3.bf16.msra.mxu0 %v238_v3  ;;  %v27_v8 = vld [vmem:[%s347_s0] sm:$0xff]  ;;  %vm35_vm1 = vcmask 130048   ;;  %v25_v9 = vld [vmem:[%s350_s3 + $0x10] sm:$0xff]  ;;  %vm117_vm2 = vcmask 261120  }
   0x5   :  { %242 = vmatpush3.bf16.msra.mxu1 %v241_v7  ;;  %v26_v10 = vld [vmem:[%s350_s3 + $0x18] sm:$0xff]  ;;  %v207_v12 = vld [vmem:[%s349_s2] ss:$0 sm:$0xff]  ;;  %s277_s9 = smov [#allocation2]   ;;  %vm191_vm3 = vcmask 64512  }
   0x6   :  { %243 = vmatprep.subr.bf16.mxu1 %v274_v2  ;;  %v244_v11 = vpack.c.bf16 %v26_v10, %v25_v9  ;;  %v209_v17 = vld [vmem:[%s351_s4] ss:$0 sm:$0xff]  ;;  %s199_s10 = sshll.u32 %s277_s9, 4  ;;  %s200_s10 = int_to_ptr.vmem [resolvable:$true] %s199_s10 }
   0x7   :  { %224 = vmatmul.mubr.msk.f32.vlgmr.msra.gmra.mrb[0].mxu0 %vm35_vm1, %v27_v8  ;;  %s250_s3 = scalar_lea.vmem %s200_s10, 128  ;;  %p255_p1 = scmp.lt.s32.totalorder %s200_s10, %s200_s10 }
   0x8   :  { %p251_p0 = scmp.ne.s32.totalorder %s200_s10, %s250_s3  ;;  %p256_p2 = scmp.lt.s32.totalorder %s250_s3, %s250_s3 }
   0x9   :  { %245 = vmatpush3.bf16.msra.mxu1 %v244_v11 }
   0xa   :  { %p257_p3 = por %p256_p2, %p255_p1 }
   0xc   :  { %p258_p4 = pnand %p257_p3, %p251_p0 }
  0xda   :  { %v105_v13 = vpop.f32.mrb[0].mxu0 }
  0xdb   :  { %v106_v14 = vadd.f32 %v207_v12, %v105_v13  ;;  %v225_v15 = vpop.f32.mrb[1].mxu0 }
  0xdd   :  { %v109_v16 = vmax.f32 %v106_v14, 0.0 }
  0xdf   :  { %235 = vmatmul.mubr.msk.f32.vlgmr.msra.gmra.mrb[0].mxu1 %vm117_vm2, %v109_v16 }
 0x1b2   :  { %v187_v18 = vpop.f32.mrb[0].mxu1 }
 0x1b3   :  { %v188_v19 = vadd.f32 %v209_v17, %v187_v18  ;;  %v236_v20 = vpop.f32.mrb[1].mxu1 }
 0x1b5   :  { %192 = vst.msk [vmem:[#allocation2] sm:$0xff] %vm191_vm3, %v188_v19 }
 0x1b6   :  { %261 = shalt.err (!%p258_p4)
}
 0x1b7   :  { %s262_s12 = scalar_lea.hbm %s352_s5, 128 }
 0x1b8   :  { %p263_p5 = scmp.ne.s32.totalorder %s352_s5, %s262_s12  ;;  %p266_p6 = scmp.lt.u32.totalorder %s262_s12, %s352_s5 }
 0x1ba   :  { %p268_p7 = pnand %p266_p6, %p263_p5 }
 0x1bc   :  { %271 = shalt.err (!%p268_p7)
}
 0x1bd   :  { %202 = dma.vmem_to_hbm [thread:$0]  %s200_s10, 128, %s352_s5, [#allocation3]  }
 0x1be   :  { %272 = dma.done.wait [#allocation3], 128  }
 0x1bf   :  { %273 = vsyncadd [#allocation3], 4294967168 }
 0x1c0   :  { %206 = vsyncpa [#allocation3], 1 }

</bundles_post_ra>
